<compile_context>
chip_gen: v7x
topology: tpu7x:2x2x1
jax: 0.10.0
libtpu: 0.0.40
codegen_flags: <defaults>
</compile_context>

<pallas_src>
import numpy as np
import jax
import jax.numpy as jnp
from jax.experimental import pallas as pl
from jax.experimental.pallas import tpu as pltpu  # noqa: F401  (TPU backend)


# -----------------------------------------------------------------------------
# Pallas kernel: single-shot identity copy of the stored preds buffer.
# -----------------------------------------------------------------------------
def _passthrough_kernel(preds_ref, out_ref):
    # forward(x) == self.preds : one full-tile copy, no grid, no pipelining.
    out_ref[...] = preds_ref[...]


def _mock_forward_impl(x, preds):
    """Forward pass of MockModuleReturnMockedPreds.

    Args:
      x:     (B, n_chans, n_times) array — ignored, exactly as in the module.
      preds: (P, n_outputs, T) float32 array stored at construction time.
    Returns:
      preds, produced by a single grid-less Pallas pass-through kernel.
    """
    del x  # forward ignores its input, by design of the mock module.
    P, O, T = preds.shape
    n = P * O * T
    # Lane-dense presentation: collapse to (1, n) so the copy is one vreg tile
    # and one store instead of P tiles of masked sub-128-lane partial stores.
    flat = preds.reshape(1, n)
    out_flat = pl.pallas_call(
        _passthrough_kernel,
        out_shape=jax.ShapeDtypeStruct((1, n), preds.dtype),
        # Block shape equals the full array shape -> satisfies (8,128) rule,
        # no grid, no per-step overhead.
        in_specs=[pl.BlockSpec((1, n), lambda: (0, 0))],
        out_specs=pl.BlockSpec((1, n), lambda: (0, 0)),
        # Output aliases the input: no separate output HBM buffer.
        input_output_aliases={0: 0},
    )(flat)
    return out_flat.reshape(P, O, T)


# jit so the flattened intermediate can be aliased without copying a
# caller-held buffer; the whole forward is one fused XLA program.
mock_forward = jax.jit(_mock_forward_impl)


# -----------------------------------------------------------------------------
# Deterministic parameter setup mirroring __init__ (the Conv1d final_layer is
# constructed by the module but never used in forward).
# -----------------------------------------------------------------------------
def make_final_layer_params(key, n_chans, n_outputs, n_times):
    # torch.nn.Conv1d(n_chans, n_outputs, kernel_size=n_times)
    # weight: (n_outputs, n_chans, n_times), bias: (n_outputs,)
    kw, kb = jax.random.split(key)
    bound = 1.0 / np.sqrt(n_chans * n_times)
    weight = jax.random.uniform(
        kw, (n_outputs, n_chans, n_times), jnp.float32, -bound, bound
    )
    bias = jax.random.uniform(kb, (n_outputs,), jnp.float32, -bound, bound)
    # TODO(synk): final_layer is never applied in forward(); parameters are
    # constructed only for structural fidelity with the torch module.
    return weight, bias


if __name__ == "__main__":
    # The mocked preds from the pytest fixture, shape (5, 2, 4).
    preds_np = np.array(
        [
            [[0.2, 0.1, 0.1, 0.1], [0.8, 0.9, 0.9, 0.9]],
            [[0.2, 0.1, 0.1, 0.1], [0.8, 0.9, 0.9, 0.9]],
            [[1.0, 1.0, 1.0, 1.0], [0.0, 0.0, 0.0, 0.0]],
            [[1.0, 1.0, 1.0, 0.2], [0.0, 0.0, 0.0, 0.8]],
            [[0.9, 0.8, 0.9, 1.0], [0.1, 0.2, 0.1, 0.0]],
        ],
        dtype=np.float32,
    )
    preds = jnp.asarray(preds_np)

    # Small EEG-like config consistent with the module's __init__ arguments.
    n_chans, n_outputs, n_times, batch = 4, 2, 16, 5

    key = jax.random.PRNGKey(0)
    kx, kp = jax.random.split(key)
    # layout: NCT (batch, n_chans, n_times) — PyTorch Conv1d input convention.
    x = jax.random.normal(kx, (batch, n_chans, n_times), jnp.float32)

    # Construct (but do not apply) the final_layer parameters, as in __init__.
    _w, _b = make_final_layer_params(kp, n_chans, n_outputs, n_times)

    out = mock_forward(x, preds)
    out = jax.block_until_ready(out)

    # Verify exact pass-through semantics: forward(x) == preds.
    np.testing.assert_array_equal(np.asarray(out), preds_np)
    assert out.shape == (5, 2, 4) and out.dtype == jnp.float32

    print("KERNEL_OK")
</pallas_src>

<mosaic_0001>
module attributes {stable_mosaic.version = 11 : i64} {
  func.func @_passthrough_kernel(%arg0: memref<1x40xf32, #tpu.memory_space<vmem>>, %arg1: memref<1x40xf32, #tpu.memory_space<vmem>>) attributes {dimension_semantics = [], scalar_prefetch = 0 : i64, scratch_operands = 0 : i64, tpu.core_type = #tpu.core_type<tc>} {
    %c0 = arith.constant 0 : index
    %c0_0 = arith.constant 0 : index
    %0 = vector.load %arg0[%c0, %c0_0] : memref<1x40xf32, #tpu.memory_space<vmem>>, vector<1x40xf32>
    %c0_1 = arith.constant 0 : index
    %c0_2 = arith.constant 0 : index
    %1 = vector.load %arg1[%c0_1, %c0_2] : memref<1x40xf32, #tpu.memory_space<vmem>>, vector<1x40xf32>
    tpu.vector_store %arg1[%c0_1, %c0_2], %0 {strides = array<i32>} : memref<1x40xf32, #tpu.memory_space<vmem>>, vector<1x40xf32>,
    return
  }
}

</mosaic_0001>

<bundles_post_ra>
// kernel: _mock_forward_impl.1
= control target key start
LH: loop header
LB: loop body
LE: loop exit
PB: predicated region body
PF: predicated region fallthrough
CT: control target
= control target key end

     0   :  { %vm9_vm0 = vcmask 319488   ;;  %s31_s0 = inlined_call_operand.vmem [shape: f32[1,40], index: 0, kind: input, shape index: {}, may-alias: {0,1}]   ;;  %s32_s1 = inlined_call_operand.vmem [shape: f32[1,40], index: 1, kind: output, shape index: {}, may-alias: {0,1}]  }
   0x1   :  { %v8_v0 = vld [vmem:[%s31_s0] sm:$0x1] }
   0x2   :  { %10 = vst.msk [vmem:[%s32_s1] sm:$0x1] %vm9_vm0, %v8_v0 }

</bundles_post_ra>
